<compile_context>
chip_gen: v6e
topology: v6e:2x2x1
jax: 0.10.0
libtpu: 0.0.40
codegen_flags: <defaults>
</compile_context>

<pallas_src>
import functools
import math

import jax
import jax.numpy as jnp
from jax.experimental import pallas as pl
from jax.experimental.pallas import tpu as pltpu


def _round_up(x, m):
    return ((x + m - 1) // m) * m


def _self_attention_bi_kernel(m1_ref, m2_ref, wqkv_ref, bqkv_ref, o_ref, *,
                              inv_root, dop, matmul_dtype):
    """One batch tile: fused QKV projection + 2x2 column-softmax attention."""
    w = wqkv_ref[...]                            # (dip, 3*dop), VMEM-resident
    b = bqkv_ref[...].astype(jnp.float32)        # (1, 3*dop)

    x1 = m1_ref[...]
    x2 = m2_ref[...]
    if matmul_dtype is not None:                 # static (trace-time) branch
        x1 = x1.astype(matmul_dtype)
        x2 = x2.astype(matmul_dtype)

    # One fused RHS, two LHS pushes (no in-kernel concat copy). f32 accumulate.
    qkv1 = jnp.dot(x1, w, preferred_element_type=jnp.float32) + b   # (tb, 3*dop)
    qkv2 = jnp.dot(x2, w, preferred_element_type=jnp.float32) + b

    q1, k1, v1 = qkv1[:, :dop], qkv1[:, dop:2 * dop], qkv1[:, 2 * dop:]
    q2, k2, v2 = qkv2[:, :dop], qkv2[:, dop:2 * dop], qkv2[:, 2 * dop:]

    # Per-batch 2x2 score matrix; the 1/sqrt(dim_out) scale is applied to the
    # (tb,1) scores (cheap) instead of the full (tb, dop) Q tensor.
    scale = jnp.float32(inv_root)
    s11 = jnp.sum(q1 * k1, axis=-1, keepdims=True) * scale
    s12 = jnp.sum(q1 * k2, axis=-1, keepdims=True) * scale
    s21 = jnp.sum(q2 * k1, axis=-1, keepdims=True) * scale
    s22 = jnp.sum(q2 * k2, axis=-1, keepdims=True) * scale

    # nn.Softmax(dim=1) over the (B,2,2) scores: normalize over the ROW index i
    # (columns sum to 1), numerically stabilized.
    c1 = jnp.maximum(s11, s21)
    c2 = jnp.maximum(s12, s22)
    e11 = jnp.exp(s11 - c1)
    e21 = jnp.exp(s21 - c1)
    e12 = jnp.exp(s12 - c2)
    e22 = jnp.exp(s22 - c2)
    # Exact divide on tiny (tb,1) tensors (the approx reciprocal was the
    # source of the previous reference mismatch and buys nothing here).
    inv_d1 = 1.0 / (e11 + e21)
    inv_d2 = 1.0 / (e12 + e22)
    a11 = e11 * inv_d1
    a21 = e21 * inv_d1
    a12 = e12 * inv_d2
    a22 = e22 * inv_d2

    # out_i = sum_j a_ij * v_j
    o1 = a11 * v1 + a12 * v2
    o2 = a21 * v1 + a22 * v2

    # Lane-dense, unmasked stores (dop is a multiple of 128, static offsets).
    o_ref[:, :dop] = o1.astype(o_ref.dtype)
    o_ref[:, dop:] = o2.astype(o_ref.dtype)


def _vmem_sizes():
    """(physical cap, tile-selection budget, vmem_limit_bytes) per generation."""
    cap = 64 * 1024 * 1024                       # conservative (v7x per-core)
    try:
        info = pltpu.get_tpu_info()
        c = int(getattr(info, "vmem_capacity_bytes", cap))
        if 16 * 1024 * 1024 <= c <= 256 * 1024 * 1024:
            cap = c                              # 128 MiB on v5e/v6e, 64 MiB v7x
    except Exception:
        pass
    vmem_limit = min(int(cap * 0.75), 100 * 1024 * 1024)
    tile_budget = int(vmem_limit * 0.7)          # headroom for compiler scratch
    return cap, tile_budget, vmem_limit


def self_attention_bi(mod1, mod2, wq, bq, wk, bk, wv, bv, *,
                      use_bf16_matmul=False):
    """Pallas implementation of SelfAttentionBi.forward.

    mod1, mod2 : (B, dim_in)
    wq/wk/wv   : (dim_in, dim_out)  (pre-transposed vs. PyTorch Linear.weight)
    bq/bk/bv   : (1, dim_out)
    returns    : (B, 2, dim_out)
    """
    B, dim_in = mod1.shape
    dim_out = wq.shape[1]
    inv_root = 1.0 / math.sqrt(dim_out)          # scale uses the ORIGINAL dim_out
    dtype = mod1.dtype
    in_item = jnp.dtype(dtype).itemsize
    sub = {4: 8, 2: 16, 1: 32}.get(in_item, 8)   # sublane multiple per dtype

    # --- lane padding: matmul / store lane dims become multiples of 128 ------
    dip = _round_up(dim_in, 128)
    dop = _round_up(dim_out, 128)
    if dip != dim_in:
        mod1 = jnp.pad(mod1, ((0, 0), (0, dip - dim_in)))
        mod2 = jnp.pad(mod2, ((0, 0), (0, dip - dim_in)))

    def pad_w(w):
        return jnp.pad(w, ((0, dip - dim_in), (0, dop - dim_out)))

    def pad_b(b):
        return jnp.pad(b, ((0, 0), (0, dop - dim_out)))

    # Fuse Q/K/V into one (dip, 3*dop) weight and one (1, 3*dop) bias.
    wqkv = jnp.concatenate([pad_w(wq), pad_w(wk), pad_w(wv)], axis=1)
    bqkv = jnp.concatenate([pad_b(bq), pad_b(bk), pad_b(bv)], axis=1)
    bqkv = bqkv.astype(jnp.float32)

    matmul_dtype = None
    if use_bf16_matmul:
        matmul_dtype = jnp.bfloat16
        wqkv = wqkv.astype(jnp.bfloat16)         # also halves resident VMEM
    w_item = jnp.dtype(wqkv.dtype).itemsize

    cap, tile_budget, vmem_limit = _vmem_sizes()

    # --- VMEM estimator: weight/bias counted x2 (the pipeliner may still
    # double-buffer constant-index blocks), streamed refs double-buffered,
    # plus f32 qkv/output temporaries. -----------------------------------
    w_bytes = 2 * (dip * 3 * dop + 3 * dop) * w_item

    def tile_bytes(tb):
        io = 2 * (2 * tb * dip * in_item) + 2 * (tb * 2 * dop * in_item)
        interm = 2 * tb * 3 * dop * 4 + 2 * tb * 2 * dop * 4
        return w_bytes + io + interm

    tb_cap = 2048 if cap >= 96 * 1024 * 1024 else 1024
    tb = _round_up(min(max(B, 1), tb_cap), sub)
    while tb > sub and tile_bytes(tb) > tile_budget:
        tb = _round_up(max(tb // 2, sub), sub)
    # v7x has 2 TensorCores: ensure >=2 "parallel" grid steps when B allows it.
    if B > sub and _round_up(B, tb) // tb == 1:
        tb = _round_up(max((B + 1) // 2, sub), sub)

    bp = _round_up(B, tb)
    if bp != B:
        mod1 = jnp.pad(mod1, ((0, bp - B), (0, 0)))
        mod2 = jnp.pad(mod2, ((0, bp - B), (0, 0)))

    # TODO(synk): for very large dim_in/dim_out (fused weight approaching ~40
    # MiB on v7x's 64 MiB VMEM) add an N-tiling grid axis over the fused weight
    # instead of shrinking tb; unnecessary at these sizes.

    kernel = functools.partial(_self_attention_bi_kernel,
                               inv_root=inv_root, dop=dop,
                               matmul_dtype=matmul_dtype)

    out = pl.pallas_call(
        kernel,
        grid=(bp // tb,),
        in_specs=[
            pl.BlockSpec((tb, dip), lambda i: (i, 0)),        # mod1 tile (streamed)
            pl.BlockSpec((tb, dip), lambda i: (i, 0)),        # mod2 tile (streamed)
            pl.BlockSpec((dip, 3 * dop), lambda i: (0, 0)),   # fused W_qkv (resident)
            pl.BlockSpec((1, 3 * dop), lambda i: (0, 0)),     # fused bias
        ],
        out_specs=pl.BlockSpec((tb, 2 * dop), lambda i: (i, 0)),
        out_shape=jax.ShapeDtypeStruct((bp, 2 * dop), dtype),
        compiler_params=pltpu.CompilerParams(
            dimension_semantics=("parallel",),   # megacore-shard batch tiles
            vmem_limit_bytes=vmem_limit,
        ),
    )(mod1, mod2, wqkv, bqkv)

    # Free row-major reshape to (bp, 2, dop); slice padding only if it exists.
    out = out.reshape(bp, 2, dop)
    if bp != B or dop != dim_out:
        out = out[:B, :, :dim_out]
    return out


def _reference(mod1, mod2, wq, bq, wk, bk, wv, bv):
    """Pure-JAX reference mirroring the PyTorch forward exactly (f32 precision)."""
    hp = jax.lax.Precision.HIGHEST
    dim_out = wq.shape[1]
    root = math.sqrt(dim_out)
    x = jnp.stack((mod1, mod2), axis=1)                          # (B, 2, dim_in)
    Q = jnp.einsum("bti,io->bto", x, wq, precision=hp) + bq[0]
    K = jnp.einsum("bti,io->bto", x, wk, precision=hp) + bk[0]
    V = jnp.einsum("bti,io->bto", x, wv, precision=hp) + bv[0]
    QK = jnp.einsum("bid,bjd->bij", Q, K, precision=hp)          # (B, 2, 2)
    attn = jax.nn.softmax(QK / root, axis=1)                     # softmax over dim=1 !
    return jnp.einsum("bij,bjd->bid", attn, V, precision=hp)


if __name__ == "__main__":
    B, dim_in, dim_out = 4, 32, 32

    key = jax.random.PRNGKey(0)
    k_m1, k_m2, k_wq, k_bq, k_wk, k_bk, k_wv, k_bv = jax.random.split(key, 8)

    mod1 = jax.random.normal(k_m1, (B, dim_in), dtype=jnp.float32)
    mod2 = jax.random.normal(k_m2, (B, dim_in), dtype=jnp.float32)

    # Deterministic PyTorch-Linear-style init: U(-1/sqrt(fan_in), 1/sqrt(fan_in)).
    bound = 1.0 / math.sqrt(dim_in)
    wq = jax.random.uniform(k_wq, (dim_in, dim_out), jnp.float32, -bound, bound)
    wk = jax.random.uniform(k_wk, (dim_in, dim_out), jnp.float32, -bound, bound)
    wv = jax.random.uniform(k_wv, (dim_in, dim_out), jnp.float32, -bound, bound)
    bq = jax.random.uniform(k_bq, (1, dim_out), jnp.float32, -bound, bound)
    bk = jax.random.uniform(k_bk, (1, dim_out), jnp.float32, -bound, bound)
    bv = jax.random.uniform(k_bv, (1, dim_out), jnp.float32, -bound, bound)

    ref = _reference(mod1, mod2, wq, bq, wk, bk, wv, bv)

    # Default (f32 matmul) path: tight parity with the PyTorch/JAX reference.
    out = self_attention_bi(mod1, mod2, wq, bq, wk, bk, wv, bv)
    out = jax.block_until_ready(out)
    assert out.shape == (B, 2, dim_out), out.shape
    assert jnp.allclose(out, ref, atol=1e-3, rtol=1e-3), "f32 path mismatch vs reference"

    # bf16-operand MXU path (perf mode): looser tolerance vs the f32 reference.
    out_bf16 = self_attention_bi(mod1, mod2, wq, bq, wk, bk, wv, bv,
                                 use_bf16_matmul=True)
    out_bf16 = jax.block_until_ready(out_bf16)
    assert out_bf16.shape == (B, 2, dim_out), out_bf16.shape
    assert jnp.allclose(out_bf16, ref, atol=5e-2, rtol=5e-2), "bf16 path mismatch vs reference"

    print("KERNEL_OK")
</pallas_src>

<mosaic_0001>
module attributes {stable_mosaic.version = 11 : i64} {
  func.func @_self_attention_bi_kernel(%arg0: i32, %arg1: memref<8x128xf32, #tpu.memory_space<vmem>>, %arg2: memref<8x128xf32, #tpu.memory_space<vmem>>, %arg3: memref<128x384xf32, #tpu.memory_space<vmem>>, %arg4: memref<1x384xf32, #tpu.memory_space<vmem>>, %arg5: memref<8x256xf32, #tpu.memory_space<vmem>>) attributes {dimension_semantics = [#tpu.dimension_semantics<parallel>], iteration_bounds = array<i64: 1>, scalar_prefetch = 0 : i64, scratch_operands = 0 : i64, tpu.core_type = #tpu.core_type<tc>, window_params = [{transform_indices = @transform_0, window_bounds = array<i64: 8, 128>}, {transform_indices = @transform_1, window_bounds = array<i64: 8, 128>}, {pipeline_mode = #tpu.pipeline_mode<synchronous>, transform_indices = @transform_2, window_bounds = array<i64: 128, 384>}, {pipeline_mode = #tpu.pipeline_mode<synchronous>, transform_indices = @transform_3, window_bounds = array<i64: 1, 384>}, {transform_indices = @transform_4, window_bounds = array<i64: 8, 256>}]} {
    %c0 = arith.constant 0 : index
    %c0_0 = arith.constant 0 : index
    %0 = vector.load %arg3[%c0, %c0_0] : memref<128x384xf32, #tpu.memory_space<vmem>>, vector<128x384xf32>
    %c0_1 = arith.constant 0 : index
    %c0_2 = arith.constant 0 : index
    %1 = vector.load %arg4[%c0_1, %c0_2] : memref<1x384xf32, #tpu.memory_space<vmem>>, vector<1x384xf32>
    %c0_3 = arith.constant 0 : index
    %c0_4 = arith.constant 0 : index
    %2 = vector.load %arg1[%c0_3, %c0_4] : memref<8x128xf32, #tpu.memory_space<vmem>>, vector<8x128xf32>
    %c0_5 = arith.constant 0 : index
    %c0_6 = arith.constant 0 : index
    %3 = vector.load %arg2[%c0_5, %c0_6] : memref<8x128xf32, #tpu.memory_space<vmem>>, vector<8x128xf32>
    %cst = arith.constant dense<0.000000e+00> : vector<8x384xf32>
    %4 = tpu.matmul %2, %0, %cst {dimension_numbers = #tpu.dot_dimension_numbers<[1], [0], [0], [1], [0, 0, 1, 1], [], []>} : vector<8x128xf32>, vector<128x384xf32>, vector<8x384xf32> -> vector<8x384xf32>
    %5 = vector.broadcast %1 : vector<1x384xf32> to vector<8x384xf32>
    %6 = arith.addf %4, %5 : vector<8x384xf32>
    %cst_7 = arith.constant dense<0.000000e+00> : vector<8x384xf32>
    %7 = tpu.matmul %3, %0, %cst_7 {dimension_numbers = #tpu.dot_dimension_numbers<[1], [0], [0], [1], [0, 0, 1, 1], [], []>} : vector<8x128xf32>, vector<128x384xf32>, vector<8x384xf32> -> vector<8x384xf32>
    %8 = vector.broadcast %1 : vector<1x384xf32> to vector<8x384xf32>
    %9 = arith.addf %7, %8 : vector<8x384xf32>
    %10 = vector.extract_strided_slice %6 {offsets = [0, 0], sizes = [8, 128], strides = [1, 1]} : vector<8x384xf32> to vector<8x128xf32>
    %11 = vector.extract_strided_slice %6 {offsets = [0, 128], sizes = [8, 128], strides = [1, 1]} : vector<8x384xf32> to vector<8x128xf32>
    %12 = vector.extract_strided_slice %6 {offsets = [0, 256], sizes = [8, 128], strides = [1, 1]} : vector<8x384xf32> to vector<8x128xf32>
    %13 = vector.extract_strided_slice %9 {offsets = [0, 0], sizes = [8, 128], strides = [1, 1]} : vector<8x384xf32> to vector<8x128xf32>
    %14 = vector.extract_strided_slice %9 {offsets = [0, 128], sizes = [8, 128], strides = [1, 1]} : vector<8x384xf32> to vector<8x128xf32>
    %15 = vector.extract_strided_slice %9 {offsets = [0, 256], sizes = [8, 128], strides = [1, 1]} : vector<8x384xf32> to vector<8x128xf32>
    %16 = arith.mulf %10, %11 : vector<8x128xf32>
    %cst_8 = arith.constant dense<0.000000e+00> : vector<8xf32>
    %17 = vector.multi_reduction <add>, %16, %cst_8 [1] : vector<8x128xf32> to vector<8xf32>
    %18 = vector.shape_cast %17 : vector<8xf32> to vector<8x1xf32>
    %cst_9 = arith.constant 0.176776692 : f32
    %19 = vector.broadcast %cst_9 : f32 to vector<8x1xf32>
    %20 = arith.mulf %18, %19 : vector<8x1xf32>
    %21 = arith.mulf %10, %14 : vector<8x128xf32>
    %cst_10 = arith.constant dense<0.000000e+00> : vector<8xf32>
    %22 = vector.multi_reduction <add>, %21, %cst_10 [1] : vector<8x128xf32> to vector<8xf32>
    %23 = vector.shape_cast %22 : vector<8xf32> to vector<8x1xf32>
    %cst_11 = arith.constant 0.176776692 : f32
    %24 = vector.broadcast %cst_11 : f32 to vector<8x1xf32>
    %25 = arith.mulf %23, %24 : vector<8x1xf32>
    %26 = arith.mulf %13, %11 : vector<8x128xf32>
    %cst_12 = arith.constant dense<0.000000e+00> : vector<8xf32>
    %27 = vector.multi_reduction <add>, %26, %cst_12 [1] : vector<8x128xf32> to vector<8xf32>
    %28 = vector.shape_cast %27 : vector<8xf32> to vector<8x1xf32>
    %cst_13 = arith.constant 0.176776692 : f32
    %29 = vector.broadcast %cst_13 : f32 to vector<8x1xf32>
    %30 = arith.mulf %28, %29 : vector<8x1xf32>
    %31 = arith.mulf %13, %14 : vector<8x128xf32>
    %cst_14 = arith.constant dense<0.000000e+00> : vector<8xf32>
    %32 = vector.multi_reduction <add>, %31, %cst_14 [1] : vector<8x128xf32> to vector<8xf32>
    %33 = vector.shape_cast %32 : vector<8xf32> to vector<8x1xf32>
    %cst_15 = arith.constant 0.176776692 : f32
    %34 = vector.broadcast %cst_15 : f32 to vector<8x1xf32>
    %35 = arith.mulf %33, %34 : vector<8x1xf32>
    %36 = arith.maximumf %20, %30 : vector<8x1xf32>
    %37 = arith.maximumf %25, %35 : vector<8x1xf32>
    %38 = arith.subf %20, %36 : vector<8x1xf32>
    %39 = math.exp %38 : vector<8x1xf32>
    %40 = arith.subf %30, %36 : vector<8x1xf32>
    %41 = math.exp %40 : vector<8x1xf32>
    %42 = arith.subf %25, %37 : vector<8x1xf32>
    %43 = math.exp %42 : vector<8x1xf32>
    %44 = arith.subf %35, %37 : vector<8x1xf32>
    %45 = math.exp %44 : vector<8x1xf32>
    %46 = arith.addf %39, %41 : vector<8x1xf32>
    %cst_16 = arith.constant 1.000000e+00 : f32
    %47 = vector.broadcast %cst_16 : f32 to vector<8x1xf32>
    %48 = arith.divf %47, %46 : vector<8x1xf32>
    %49 = arith.addf %43, %45 : vector<8x1xf32>
    %cst_17 = arith.constant 1.000000e+00 : f32
    %50 = vector.broadcast %cst_17 : f32 to vector<8x1xf32>
    %51 = arith.divf %50, %49 : vector<8x1xf32>
    %52 = arith.mulf %39, %48 : vector<8x1xf32>
    %53 = arith.mulf %41, %48 : vector<8x1xf32>
    %54 = arith.mulf %43, %51 : vector<8x1xf32>
    %55 = arith.mulf %45, %51 : vector<8x1xf32>
    %56 = vector.broadcast %52 : vector<8x1xf32> to vector<8x128xf32>
    %57 = arith.mulf %56, %12 : vector<8x128xf32>
    %58 = vector.broadcast %54 : vector<8x1xf32> to vector<8x128xf32>
    %59 = arith.mulf %58, %15 : vector<8x128xf32>
    %60 = arith.addf %57, %59 : vector<8x128xf32>
    %61 = vector.broadcast %53 : vector<8x1xf32> to vector<8x128xf32>
    %62 = arith.mulf %61, %12 : vector<8x128xf32>
    %63 = vector.broadcast %55 : vector<8x1xf32> to vector<8x128xf32>
    %64 = arith.mulf %63, %15 : vector<8x128xf32>
    %65 = arith.addf %62, %64 : vector<8x128xf32>
    %c0_18 = arith.constant 0 : index
    %c0_19 = arith.constant 0 : index
    %66 = vector.load %arg5[%c0_18, %c0_19] : memref<8x256xf32, #tpu.memory_space<vmem>>, vector<8x128xf32>
    tpu.vector_store %arg5[%c0_18, %c0_19], %60 {strides = array<i32>} : memref<8x256xf32, #tpu.memory_space<vmem>>, vector<8x128xf32>,
    %c0_20 = arith.constant 0 : index
    %c128 = arith.constant 128 : index
    %67 = vector.load %arg5[%c0_20, %c128] : memref<8x256xf32, #tpu.memory_space<vmem>>, vector<8x128xf32>
    tpu.vector_store %arg5[%c0_20, %c128], %65 {strides = array<i32>} : memref<8x256xf32, #tpu.memory_space<vmem>>, vector<8x128xf32>,
    return
  }
  func.func @transform_0(%arg0: i32) -> (i32, i32) {
    %c0_i32 = arith.constant 0 : i32
    %c0_i32_0 = arith.constant 0 : i32
    return %arg0, %c0_i32 : i32, i32
  }
  func.func @transform_1(%arg0: i32) -> (i32, i32) {
    %c0_i32 = arith.constant 0 : i32
    %c0_i32_0 = arith.constant 0 : i32
    return %arg0, %c0_i32 : i32, i32
  }
  func.func @transform_2(%arg0: i32) -> (i32, i32) {
    %c0_i32 = arith.constant 0 : i32
    %c0_i32_0 = arith.constant 0 : i32
    %c0_i32_1 = arith.constant 0 : i32
    return %c0_i32, %c0_i32_0 : i32, i32
  }
  func.func @transform_3(%arg0: i32) -> (i32, i32) {
    %c0_i32 = arith.constant 0 : i32
    %c0_i32_0 = arith.constant 0 : i32
    %c0_i32_1 = arith.constant 0 : i32
    return %c0_i32, %c0_i32_0 : i32, i32
  }
  func.func @transform_4(%arg0: i32) -> (i32, i32) {
    %c0_i32 = arith.constant 0 : i32
    %c0_i32_0 = arith.constant 0 : i32
    return %arg0, %c0_i32 : i32, i32
  }
}

</mosaic_0001>

<bundles_post_ra>
// kernel: tpu_custom_call.1
= control target key start
LH: loop header
LB: loop body
LE: loop exit
PB: predicated region body
PF: predicated region fallthrough
CT: control target
= control target key end

     0   :  { %9 = vsyncpa [#allocation3], 0  ;;  %s952_s0 = inlined_call_operand.hbm [shape: f32[8,128], index: 0, kind: input, shape index: {}]   ;;  %s953_s1 = inlined_call_operand.hbm [shape: f32[8,128], index: 1, kind: input, shape index: {}]   ;;  %s954_s2 = inlined_call_operand.hbm [shape: f32[128,384], index: 2, kind: input, shape index: {}]   ;;  %s955_s3 = inlined_call_operand.vmem [shape: f32[1,384], index: 3, kind: input, shape index: {}]   ;;  %s956_s4 = inlined_call_operand.hbm [shape: f32[8,256], index: 4, kind: output, shape index: {}]  }
   0x1   :  { %10 = vsyncpa [#allocation6], 0 }
   0x2   :  { %11 = vsyncpa [#allocation4], 0  ;;  %s678_s15 = smov [#allocation5]   ;;  %s679_s17 = smov [#allocation2]  }
   0x3   :  { %s28_s16 = sshll.u32 %s678_s15, 4  ;;  %s18_s18 = sshll.u32 %s679_s17, 4  ;;  %s29_s16 = int_to_ptr.vmem [resolvable:$true] %s28_s16  ;;  %s19_s18 = int_to_ptr.vmem [resolvable:$true] %s18_s18 }
   0x4   :  { %s600_s19 = scalar_lea.vmem %s29_s16, 128  ;;  %p605_p1 = scmp.lt.s32.totalorder %s29_s16, %s29_s16 }
   0x5   :  { %p601_p0 = scmp.ne.s32.totalorder %s29_s16, %s600_s19  ;;  %p606_p2 = scmp.lt.s32.totalorder %s600_s19, %s600_s19 }
   0x7   :  { %p607_p3 = por %p606_p2, %p605_p1 }
   0x9   :  { %p608_p4 = pnand %p607_p3, %p601_p0 }
   0xb   :  { %611 = shalt.err (!%p608_p4)
}
   0xc   :  { %31 = dma.hbm_to_vmem [thread:$0]  %s953_s1, 128, %s29_s16, [#allocation6]  }
   0xd   :  { %s620_s22 = scalar_lea.vmem %s19_s18, 128  ;;  %p625_p6 = scmp.lt.s32.totalorder %s19_s18, %s19_s18 }
   0xe   :  { %p621_p5 = scmp.ne.s32.totalorder %s19_s18, %s620_s22  ;;  %p626_p7 = scmp.lt.s32.totalorder %s620_s22, %s620_s22 }
  0x10   :  { %p627_p8 = por %p626_p7, %p625_p6 }
  0x12   :  { %p628_p9 = pnand %p627_p8, %p621_p5 }
  0x14   :  { %631 = shalt.err (!%p628_p9)
}
  0x15   :  { %21 = dma.hbm_to_vmem [thread:$0]  %s952_s0, 128, %s19_s18, [#allocation3]  }
  0x16   :  { %s680_s25 = smov [#allocation7]  }
  0x17   :  { %s37_s26 = sshll.u32 %s680_s25, 4  ;;  %s38_s26 = int_to_ptr.vmem [resolvable:$true] %s37_s26 }
  0x18   :  { %s640_s27 = scalar_lea.vmem %s38_s26, 6144  ;;  %p645_p11 = scmp.lt.s32.totalorder %s38_s26, %s38_s26 }
  0x19   :  { %p641_p10 = scmp.ne.s32.totalorder %s38_s26, %s640_s27  ;;  %p646_p12 = scmp.lt.s32.totalorder %s640_s27, %s640_s27 }
  0x1b   :  { %p647_p13 = por %p646_p12, %p645_p11 }
  0x1d   :  { %p648_p0 = pnand %p647_p13, %p641_p10 }
  0x1f   :  { %651 = shalt.err (!%p648_p0)
}
  0x20   :  { %s681_s1 = smov 384   ;;  %s682_s28 = smov 24  }
  0x21   :  { %43 = dma.hbm_to_vmem [thread:$0]  %s954_s2, 6144, %s38_s26, [#allocation6], %s681_s1, %s681_s1, %s682_s28  }
  0x22   :  { %672 = dma.done.wait [#allocation3], 128  }
  0x23   :  { %673 = vsyncadd [#allocation3], 4294967168 }
  0x24   :  { %674 = dma.done.wait [#allocation6], 6272  }
  0x25   :  { %675 = vsyncadd [#allocation6], 4294961024  ;;  %v683_v0 = vmov 0.0   ;;  %vm684_vm0 = vmmov 0   ;;  %v724_v1 = vld [vmem:[#allocation7 + $0x170] sm:$0xff]  ;;  %v726_v2 = vld [vmem:[#allocation7 + $0x168] sm:$0xff]  ;;  %v107_v51 = vlaneseq }
  0x26   :  { %186 = vmatprep.mubr.f32.mxu0 %v683_v0  ;;  %502 = vmatprep.subr.mxu1 %v683_v0  ;;  %v728_v3 = vld [vmem:[#allocation7 + $0x158] sm:$0xff]  ;;  %v731_v4 = vld [vmem:[#allocation7 + $0x150] sm:$0xff]  ;;  %v734_v5 = vld [vmem:[#allocation7 + $0x140] sm:$0xff] }
  0x27   :  { %534 = vmatprep.mubr.msk.f32.mxu1 %vm684_vm0, %v683_v0  ;;  %122 = vmatprep.subr.mxu0 %v724_v1  ;;  %v737_v6 = vld [vmem:[#allocation7 + $0x138] sm:$0xff]  ;;  %v740_v7 = vld [vmem:[#allocation7 + $0x128] sm:$0xff]  ;;  %v743_v8 = vld [vmem:[#allocation7 + $0x120] sm:$0xff]  ;;  %v108_v52 = vshrl.u32 %v107_v51, 7 }
  0x28   :  { %123 = vmatpush1.msra.mxu0 %v726_v2  ;;  %v746_v9 = vld [vmem:[#allocation7 + $0x110] sm:$0xff]  ;;  %v749_v10 = vld [vmem:[#allocation7 + $0x108] sm:$0xff]  ;;  %v752_v11 = vld [vmem:[#allocation7 + $0xf8] sm:$0xff] }
  0x29   :  { %124 = vmatprep.subr.mxu0 %v728_v3  ;;  %v755_v12 = vld [vmem:[#allocation7 + $0xf0] sm:$0xff]  ;;  %v758_v13 = vld [vmem:[#allocation7 + $0xe0] sm:$0xff]  ;;  %v761_v14 = vld [vmem:[#allocation7 + $0xd8] sm:$0xff]  ;;  %v109_v53 = vsub.s32 0, %v108_v52  ;;  %v113_v55 = vsub.s32 1, %v108_v52 }
  0x2a   :  { %125 = vmatpush1.msra.mxu0 %v731_v4  ;;  %v763_v15 = vld [vmem:[#allocation7 + $0x178] sm:$0xff]  ;;  %v765_v16 = vld [vmem:[#allocation7 + $0x160] sm:$0xff]  ;;  %v768_v17 = vld [vmem:[#allocation7 + $0xc8] sm:$0xff] }
  0x2b   :  { %126 = vmatprep.subr.mxu0 %v734_v5  ;;  %503 = vmatpush3.msra.mxu1 %v763_v15  ;;  %v772_v18 = vld [vmem:[#allocation7 + $0xc0] sm:$0xff]  ;;  %v775_v19 = vld [vmem:[#allocation7 + $0x148] sm:$0xff]  ;;  %v778_v20 = vld [vmem:[#allocation7 + $0xb0] sm:$0xff] }
  0x2c   :  { %127 = vmatpush1.msra.mxu0 %v737_v6  ;;  %504 = vmatprep.subr.mxu1 %v683_v0  ;;  %v782_v21 = vld [vmem:[#allocation7 + $0xa8] sm:$0xff]  ;;  %v785_v22 = vld [vmem:[#allocation7 + $0x130] sm:$0xff]  ;;  %v788_v23 = vld [vmem:[#allocation7 + $0x98] sm:$0xff] }
  0x2d   :  { %128 = vmatprep.subr.mxu0 %v740_v7  ;;  %505 = vmatpush3.msra.mxu1 %v765_v16  ;;  %v792_v24 = vld [vmem:[#allocation7 + $0x90] sm:$0xff]  ;;  %v795_v25 = vld [vmem:[#allocation7 + $0x118] sm:$0xff]  ;;  %v798_v26 = vld [vmem:[#allocation7 + $0x80] sm:$0xff] }
  0x2e   :  { %129 = vmatpush1.msra.mxu0 %v743_v8  ;;  %506 = vmatprep.subr.mxu1 %v683_v0  ;;  %v802_v27 = vld [vmem:[#allocation7 + $0x78] sm:$0xff]  ;;  %v805_v28 = vld [vmem:[#allocation7 + $0x100] sm:$0xff]  ;;  %v808_v29 = vld [vmem:[#allocation7 + $0x68] sm:$0xff] }
  0x2f   :  { %130 = vmatprep.subr.mxu0 %v746_v9  ;;  %507 = vmatpush3.msra.mxu1 %v775_v19  ;;  %v812_v30 = vld [vmem:[#allocation7 + $0x60] sm:$0xff]  ;;  %v815_v31 = vld [vmem:[#allocation7 + $0xe8] sm:$0xff]  ;;  %v818_v32 = vld [vmem:[#allocation7 + $0x50] sm:$0xff] }
  0x30   :  { %131 = vmatpush1.msra.mxu0 %v749_v10  ;;  %508 = vmatprep.subr.mxu1 %v683_v0  ;;  %v822_v33 = vld [vmem:[#allocation7 + $0x48] sm:$0xff]  ;;  %v825_v34 = vld [vmem:[#allocation7 + $0xd0] sm:$0xff]  ;;  %v828_v35 = vld [vmem:[#allocation7 + $0x38] sm:$0xff] }
  0x31   :  { %132 = vmatprep.subr.mxu0 %v752_v11  ;;  %509 = vmatpush3.msra.mxu1 %v785_v22  ;;  %v832_v36 = vld [vmem:[#allocation7 + $0x30] sm:$0xff]  ;;  %v835_v37 = vld [vmem:[#allocation7 + $0xb8] sm:$0xff]  ;;  %v838_v38 = vld [vmem:[#allocation7 + $0x20] sm:$0xff] }
  0x32   :  { %133 = vmatpush1.msra.mxu0 %v755_v12  ;;  %510 = vmatprep.subr.mxu1 %v683_v0  ;;  %v842_v39 = vld [vmem:[#allocation7 + $0x18] sm:$0xff]  ;;  %v845_v40 = vld [vmem:[#allocation7 + $0xa0] sm:$0xff]  ;;  %v848_v41 = vld [vmem:[#allocation7 + $0x8] sm:$0xff] }
  0x33   :  { %134 = vmatprep.subr.mxu0 %v758_v13  ;;  %511 = vmatpush3.msra.mxu1 %v795_v25  ;;  %v852_v42 = vld [vmem:[#allocation7] sm:$0xff]  ;;  %v855_v43 = vld [vmem:[#allocation7 + $0x88] sm:$0xff]  ;;  %v104_v44 = vld [vmem:[#allocation2] sm:$0xff] }
  0x34   :  { %135 = vmatpush1.msra.mxu0 %v761_v14  ;;  %512 = vmatprep.subr.mxu1 %v683_v0  ;;  %v864_v45 = vld [vmem:[#allocation7 + $0x70] sm:$0xff]  ;;  %v870_v46 = vld [vmem:[#allocation7 + $0x58] sm:$0xff]  ;;  %v876_v47 = vld [vmem:[#allocation7 + $0x40] sm:$0xff] }
  0x35   :  { %136 = vmatprep.subr.mxu0 %v768_v17  ;;  %513 = vmatpush3.msra.mxu1 %v805_v28  ;;  %v882_v48 = vld [vmem:[#allocation7 + $0x28] sm:$0xff]  ;;  %v57_v49 = vld [vmem:[#allocation7 + $0x10] sm:$0xff]  ;;  %v105_v50 = vld [vmem:[#allocation5] sm:$0xff] }
  0x36   :  { %137 = vmatpush1.msra.mxu0 %v772_v18  ;;  %514 = vmatprep.subr.mxu1 %v683_v0  ;;  %v103_v54 = vld [vmem:[%s955_s3] sm:$0x7]  ;;  %s685_s3 = smov [#allocation8]  }
  0x37   :  { %138 = vmatprep.subr.mxu0 %v778_v20  ;;  %515 = vmatpush3.msra.mxu1 %v815_v31  ;;  %v110_v56 = vrot.slane %v103_v54, %v109_v53  ;;  %v114_v57 = vrot.slane %v103_v54, %v113_v55  ;;  %s458_s5 = sshll.u32 %s685_s3, 4  ;;  %s459_s5 = int_to_ptr.vmem [resolvable:$true] %s458_s5 }
  0x38   :  { %139 = vmatpush1.msra.mxu0 %v782_v21  ;;  %516 = vmatprep.subr.mxu1 %v683_v0  ;;  %s652_s6 = scalar_lea.vmem %s459_s5, 256  ;;  %p657_p2 = scmp.lt.s32.totalorder %s459_s5, %s459_s5 }
  0x39   :  { %140 = vmatprep.subr.mxu0 %v788_v23  ;;  %517 = vmatpush3.msra.mxu1 %v825_v34  ;;  %p653_p1 = scmp.ne.s32.totalorder %s459_s5, %s652_s6  ;;  %p658_p3 = scmp.lt.s32.totalorder %s652_s6, %s652_s6 }
  0x3a   :  { %141 = vmatpush1.msra.mxu0 %v792_v24  ;;  %518 = vmatprep.subr.mxu1 %v683_v0 }
  0x3b   :  { %142 = vmatprep.subr.mxu0 %v798_v26  ;;  %519 = vmatpush3.msra.mxu1 %v835_v37  ;;  %p659_p4 = por %p658_p3, %p657_p2 }
  0x3c   :  { %143 = vmatpush1.msra.mxu0 %v802_v27  ;;  %520 = vmatprep.subr.mxu1 %v683_v0 }
  0x3d   :  { %144 = vmatprep.subr.mxu0 %v808_v29  ;;  %521 = vmatpush3.msra.mxu1 %v845_v40  ;;  %p660_p5 = pnand %p659_p4, %p653_p1 }
  0x3e   :  { %145 = vmatpush1.msra.mxu0 %v812_v30  ;;  %522 = vmatprep.subr.mxu1 %v683_v0 }
  0x3f   :  { %146 = vmatprep.subr.mxu0 %v818_v32  ;;  %523 = vmatpush3.msra.mxu1 %v855_v43 }
  0x40   :  { %147 = vmatpush1.msra.mxu0 %v822_v33  ;;  %524 = vmatprep.subr.mxu1 %v683_v0 }
  0x41   :  { %148 = vmatprep.subr.mxu0 %v828_v35  ;;  %525 = vmatpush3.msra.mxu1 %v864_v45 }
  0x42   :  { %149 = vmatpush1.msra.mxu0 %v832_v36  ;;  %526 = vmatprep.subr.mxu1 %v683_v0 }
  0x43   :  { %150 = vmatprep.subr.mxu0 %v838_v38  ;;  %527 = vmatpush3.msra.mxu1 %v870_v46 }
  0x44   :  { %151 = vmatpush1.msra.mxu0 %v842_v39  ;;  %528 = vmatprep.subr.mxu1 %v683_v0 }
  0x45   :  { %152 = vmatprep.subr.mxu0 %v848_v41  ;;  %529 = vmatpush3.msra.mxu1 %v876_v47 }
  0x46   :  { %153 = vmatpush1.msra.mxu0 %v852_v42  ;;  %530 = vmatprep.subr.mxu1 %v683_v0 }
  0x47   :  { %187 = vmatmul.mubr.f32.vlgmr.msra.gmra.mxu0 %v104_v44  ;;  %263 = vmatprep.subr.mxu0 %v724_v1 }
  0x48   :  { %264 = vmatpush1.msra.mxu0 %v726_v2  ;;  %327 = vmatprep.mubr.f32.mxu0 %v683_v0 }
  0x49   :  { %265 = vmatprep.subr.mxu0 %v728_v3  ;;  %531 = vmatpush3.msra.mxu1 %v882_v48 }
  0x4a   :  { %266 = vmatpush1.msra.mxu0 %v731_v4  ;;  %532 = vmatprep.subr.mxu1 %v683_v0 }
  0x4b   :  { %267 = vmatprep.subr.mxu0 %v734_v5  ;;  %533 = vmatpush3.msra.mxu1 %v57_v49 }
  0x4c   :  { %268 = vmatpush1.msra.mxu0 %v737_v6  ;;  %537 = vmatprep.subr.mxu1 %v683_v0 }
  0x4d   :  { %269 = vmatprep.subr.mxu0 %v740_v7  ;;  %535 = vmatmul.mubr.f32.vlgmr.msra.gmra.mxu1 %v104_v44 }
  0x4e   :  { %270 = vmatpush1.msra.mxu0 %v743_v8  ;;  %538 = vmatpush3.msra.mxu1 %v763_v15 }
  0x4f   :  { %271 = vmatprep.subr.mxu0 %v746_v9  ;;  %539 = vmatprep.subr.mxu1 %v683_v0 }
  0x50   :  { %272 = vmatpush1.msra.mxu0 %v749_v10  ;;  %540 = vmatpush3.msra.mxu1 %v765_v16 }
  0x51   :  { %273 = vmatprep.subr.mxu0 %v752_v11  ;;  %541 = vmatprep.subr.mxu1 %v683_v0 }
  0x52   :  { %274 = vmatpush1.msra.mxu0 %v755_v12  ;;  %542 = vmatpush3.msra.mxu1 %v775_v19 }
  0x53   :  { %275 = vmatprep.subr.mxu0 %v758_v13  ;;  %543 = vmatprep.subr.mxu1 %v683_v0 }
  0x54   :  { %276 = vmatpush1.msra.mxu0 %v761_v14  ;;  %544 = vmatpush3.msra.mxu1 %v785_v22 }
  0x55   :  { %277 = vmatprep.subr.mxu0 %v768_v17  ;;  %545 = vmatprep.subr.mxu1 %v683_v0 }
  0x56   :  { %278 = vmatpush1.msra.mxu0 %v772_v18  ;;  %546 = vmatpush3.msra.mxu1 %v795_v25 }
  0x57   :  { %279 = vmatprep.subr.mxu0 %v778_v20  ;;  %547 = vmatprep.subr.mxu1 %v683_v0 }
  0x58   :  { %280 = vmatpush1.msra.mxu0 %v782_v21  ;;  %548 = vmatpush3.msra.mxu1 %v805_v28 }
  0x59   :  { %281 = vmatprep.subr.mxu0 %v788_v23  ;;  %549 = vmatprep.subr.mxu1 %v683_v0 }
  0x5a   :  { %282 = vmatpush1.msra.mxu0 %v792_v24  ;;  %550 = vmatpush3.msra.mxu1 %v815_v31 }
  0x5b   :  { %283 = vmatprep.subr.mxu0 %v798_v26  ;;  %551 = vmatprep.subr.mxu1 %v683_v0 }
  0x5c   :  { %284 = vmatpush1.msra.mxu0 %v802_v27  ;;  %552 = vmatpush3.msra.mxu1 %v825_v34  ;;  %v117_v34 = vsub.s32 2, %v108_v52 }
  0x5d   :  { %285 = vmatprep.subr.mxu0 %v808_v29  ;;  %553 = vmatprep.subr.mxu1 %v683_v0 }
  0x5e   :  { %286 = vmatpush1.msra.mxu0 %v812_v30  ;;  %554 = vmatpush3.msra.mxu1 %v835_v37 }
  0x5f   :  { %287 = vmatprep.subr.mxu0 %v818_v32  ;;  %555 = vmatprep.subr.mxu1 %v683_v0 }
  0x60   :  { %288 = vmatpush1.msra.mxu0 %v822_v33  ;;  %556 = vmatpush3.msra.mxu1 %v845_v40 }
  0x61   :  { %289 = vmatprep.subr.mxu0 %v828_v35  ;;  %557 = vmatprep.subr.mxu1 %v683_v0 }
  0x62   :  { %290 = vmatpush1.msra.mxu0 %v832_v36  ;;  %569 = vmatprep.mubr.msk.f32.mxu1 %vm684_vm0, %v683_v0  ;;  %v118_v36 = vrot.slane %v103_v54, %v117_v34 }
  0x63   :  { %291 = vmatprep.subr.mxu0 %v838_v38  ;;  %558 = vmatpush3.msra.mxu1 %v855_v43 }
  0x64   :  { %292 = vmatpush1.msra.mxu0 %v842_v39  ;;  %559 = vmatprep.subr.mxu1 %v683_v0 }
  0x65   :  { %293 = vmatprep.subr.mxu0 %v848_v41  ;;  %560 = vmatpush3.msra.mxu1 %v864_v45 }
  0x66   :  { %294 = vmatpush1.msra.mxu0 %v852_v42  ;;  %561 = vmatprep.subr.mxu1 %v683_v0 }
  0x67   :  { %328 = vmatmul.mubr.f32.vlgmr.msra.gmra.mxu0 %v105_v50  ;;  %562 = vmatpush3.msra.mxu1 %v870_v46 }
  0x68   :  { %563 = vmatprep.subr.mxu1 %v683_v0 }
  0x69   :  { %564 = vmatpush3.msra.mxu1 %v876_v47 }
  0x6a   :  { %565 = vmatprep.subr.mxu1 %v683_v0 }
  0x6b   :  { %566 = vmatpush3.msra.mxu1 %v882_v48 }
  0x6c   :  { %567 = vmatprep.subr.mxu1 %v683_v0 }
  0x6d   :  { %568 = vmatpush3.msra.mxu1 %v57_v49 }
  0x6e   :  { %570 = vmatmul.mubr.f32.vlgmr.msra.gmra.mxu1 %v105_v50 }
 0x107   :  { %v188_v58 = vpop.f32.mrf.mxu0 }
 0x108   :  { %v189_v59 = vadd.f32 %v188_v58, %v110_v56 }
 0x109   :  { %v190_v60 = vpop.f32.mrf.mxu0 }
 0x10a   :  { %v191_v61 = vadd.f32 %v190_v60, %v114_v57 }
 0x10c   :  { %v404_v62 = vmul.f32 %v191_v61, %v189_v59 }
 0x10d   :  { %v259_v6 = vpop.f32.mrf.mxu1 }
 0x10e   :  { %405 = vadd.xlane.f32.xlu0 %v404_v62  ;;  %v260_v41 = vadd.f32 %v259_v6, %v118_v36 }
 0x10f   :  { %v536_v7 = vpop.f32.mrf.mxu1 }
 0x127   :  { %v329_v63 = vpop.f32.mrf.mxu0 }
 0x128   :  { %v330_v0 = vadd.f32 %v329_v63, %v110_v56 }
 0x129   :  { %v331_v1 = vpop.f32.mrf.mxu0 }
 0x12a   :  { %v332_v2 = vadd.f32 %v331_v1, %v114_v57  ;;  %v412_v3 = vmul.f32 %v330_v0, %v191_v61 }
 0x12c   :  { %413 = vadd.xlane.f32.xlu1 %v412_v3  ;;  %v408_v4 = vmul.f32 %v332_v2, %v189_v59  ;;  %v416_v5 = vmul.f32 %v332_v2, %v330_v0 }
 0x12e   :  { %409 = vadd.xlane.f32.xlu0 %v408_v4  ;;  %v400_v8 = vpop.f32.mrf.mxu1 }
 0x12f   :  { %v401_v39 = vadd.f32 %v400_v8, %v118_v36 }
 0x130   :  { %417 = vadd.xlane.f32.xlu1 %v416_v5  ;;  %v571_v9 = vpop.f32.mrf.mxu1 }
 0x197   :  { %v406_v10 = vpop.xlane.xlu0 %405 }
 0x198   :  { %v407_v12 = vmul.f32 0.17677669, %v406_v10 }
 0x1b5   :  { %v414_v11 = vpop.xlane.xlu1 %413 }
 0x1b6   :  { %v415_v13 = vmul.f32 0.17677669, %v414_v11 }
 0x1b7   :  { %v410_v14 = vpop.xlane.xlu0 %409 }
 0x1b8   :  { %v420_v15 = vmax.f32 %v407_v12, %v415_v13  ;;  %v411_v19 = vmul.f32 0.17677669, %v410_v14 }
 0x1b9   :  { %v418_v16 = vpop.xlane.xlu1 %417 }
 0x1ba   :  { %v422_v17 = vsub.f32 %v407_v12, %v420_v15  ;;  %v425_v18 = vsub.f32 %v415_v13, %v420_v15  ;;  %v419_v20 = vmul.f32 0.17677669, %v418_v16 }
 0x1bc   :  { %v423_v21 = vmul.f32 1.442695, %v422_v17  ;;  %v426_v22 = vmul.f32 1.442695, %v425_v18  ;;  %v421_v23 = vmax.f32 %v411_v19, %v419_v20 }
 0x1be   :  { %580 = vpow2.f32 %v423_v21  ;;  %v428_v24 = vsub.f32 %v411_v19, %v421_v23  ;;  %v431_v25 = vsub.f32 %v419_v20, %v421_v23 }
 0x1bf   :  { %582 = vpow2.f32 %v426_v22 }
 0x1c0   :  { %v429_v26 = vmul.f32 1.442695, %v428_v24  ;;  %v432_v27 = vmul.f32 1.442695, %v431_v25 }
 0x1c2   :  { %584 = vpow2.f32 %v429_v26 }
 0x1c3   :  { %586 = vpow2.f32 %v432_v27 }
 0x1cb   :  { %v581_v28 = vpop.eup %580 }
 0x1cc   :  { %v583_v29 = vpop.eup %582 }
 0x1cd   :  { %v434_v30 = vadd.f32 %v583_v29, %v581_v28 }
 0x1cf   :  { %v585_v31 = vpop.eup %584  ;;  %588 = vrcp.f32 %v434_v30 }
 0x1d0   :  { %v587_v32 = vpop.eup %586 }
 0x1d1   :  { %v437_v33 = vadd.f32 %v587_v32, %v585_v31 }
 0x1d3   :  { %590 = vrcp.f32 %v437_v33 }
 0x1dc   :  { %v589_v35 = vpop.eup %588 }
 0x1dd   :  { %v440_v37 = vmul.f32 %v589_v35, %v581_v28  ;;  %v441_v38 = vmul.f32 %v589_v35, %v583_v29 }
 0x1df   :  { %v444_v44 = vmul.f32 %v440_v37, %v260_v41  ;;  %v447_v45 = vmul.f32 %v441_v38, %v260_v41 }
 0x1e0   :  { %v591_v40 = vpop.eup %590 }
 0x1e1   :  { %v442_v42 = vmul.f32 %v591_v40, %v585_v31  ;;  %v443_v43 = vmul.f32 %v591_v40, %v587_v32 }
 0x1e3   :  { %v445_v46 = vmul.f32 %v442_v42, %v401_v39  ;;  %v448_v47 = vmul.f32 %v443_v43, %v401_v39 }
 0x1e5   :  { %v446_v48 = vadd.f32 %v445_v46, %v444_v44  ;;  %v449_v49 = vadd.f32 %v448_v47, %v447_v45 }
 0x1e7   :  { %450 = vst [vmem:[#allocation8] sm:$0xff] %v446_v48  ;;  %451 = vst [vmem:[#allocation8 + $0x8] sm:$0xff] %v449_v49 }
 0x1e8   :  { %663 = shalt.err (!%p660_p5)
}
 0x1e9   :  { %461 = dma.vmem_to_hbm [thread:$0]  %s459_s5, 256, %s956_s4, [#allocation4]  }
 0x1ea   :  { %676 = dma.done.wait [#allocation4], 256  }
 0x1eb   :  { %677 = vsyncadd [#allocation4], 4294967040 }
 0x1ec   :  { %465 = vsyncpa [#allocation3], 1 }
 0x1ed   :  { %466 = vsyncpa [#allocation6], 1 }
 0x1ee   :  { %467 = vsyncpa [#allocation4], 1 }

</bundles_post_ra>
